<compile_context>
chip_gen: v7x
topology: tpu7x:2x2x1
jax: 0.10.0
libtpu: 0.0.40
codegen_flags: <defaults>
</compile_context>

<pallas_src>
import functools

import jax
import jax.numpy as jnp
from jax import lax
from jax.experimental import pallas as pl
from jax.experimental.pallas import tpu as pltpu


def _cdiv(a, b):
    return -(-a // b)


def _round_up(x, mult):
    return _cdiv(x, mult) * mult


def _mmd_tile_kernel(p_ref, q_ref, out_ref, acc_ref, *,
                     n, m, tile, grid_blocks, n_t, mask_last_offset):
    i = pl.program_id(0)          # row block
    t = pl.program_id(1)          # column offset; column block = (i + t) % G

    @pl.when(t == 0)
    def _init():
        acc_ref[...] = jnp.zeros_like(acc_ref)

    def compute_tile():
        p = p_ref[...]            # (tile, D+2) f32: [2/D^2 * z, -|z|^2/D^2, 1]
        q = q_ref[...]            # (tile, D+2) f32: [z, 1, -|z|^2/D^2]
        # One MXU gemm produces the full exponent  -||z_r - z_c||^2 / D^2.
        e = lax.dot_general(p, q,
                            dimension_numbers=(((1,), (1,)), ((), ())),
                            preferred_element_type=jnp.float32,
                            precision=lax.Precision.HIGHEST)     # (tile, tile)
        e = jnp.minimum(e, 0.0)   # exact result <= 0; clamp rounding noise
        k = jnp.exp(e)            # EUP

        # Column weights (+1/N, -1/M, 0 for padding); off-diagonal block pairs
        # are visited once, so weight them 2x (k is symmetric).
        jb = (i + t) % grid_blocks
        ci = jb * tile + lax.broadcasted_iota(jnp.int32, (1, tile), 1)
        v = jnp.where(ci < n, jnp.float32(1.0 / n),
                      jnp.where(ci < n + m, jnp.float32(-1.0 / m),
                                jnp.float32(0.0)))
        w = jnp.where(t == 0, jnp.float32(1.0), jnp.float32(2.0))
        acc_ref[...] += jnp.sum(k * (v * w), axis=1, keepdims=True)

    if mask_last_offset:
        # Even G: offset G/2 pairs block i with block i+G/2; process each such
        # pair exactly once (rows i < G/2 only).
        pl.when(jnp.logical_or(t < n_t - 1, i < grid_blocks // 2))(compute_tile)
    else:
        compute_tile()

    @pl.when(t == n_t - 1)
    def _finalize():
        ri = i * tile + lax.broadcasted_iota(jnp.int32, (tile, 1), 0)
        u = jnp.where(ri < n, jnp.float32(1.0 / n),
                      jnp.where(ri < n + m, jnp.float32(-1.0 / m),
                                jnp.float32(0.0)))
        val = jnp.sum(u * acc_ref[...])
        # One scalar per row block, broadcast into a standard (8,128) tile.
        out_ref[...] = jnp.full(out_ref.shape, val, dtype=out_ref.dtype)


def continuous_kernel_mmd_loss(posterior_z, prior_z, *, max_tile=512):
    """posterior_z: (N, D), prior_z: (M, D) -> scalar f32 MMD loss."""
    n, d = posterior_z.shape
    m, d_ = prior_z.shape
    assert d == d_, "latent dims must match"
    assert n > 0 and m > 0, "MMD weights 1/N, 1/M require non-empty batches"

    total = n + m
    # Adaptive tile: padding stays within one sublane group of `total`; once the
    # problem is big enough, force >=2 row blocks so both v7x cores get work.
    nblocks = _cdiv(total, max_tile)
    if total >= 256:
        nblocks = max(nblocks, 2)
    tile = max(_round_up(_cdiv(total, nblocks), 8), 8)
    padded = nblocks * tile
    g = nblocks

    inv = 1.0 / float(d * d)

    # O((N+M)*D) preprocessing in the wrapper (cheap at MMD sizes): fused z,
    # pre-scaled row norms and the augmented P/Q feature matrices.
    # TODO(synk): for very large N+M, stream x/y separately via scalar-prefetched
    # row offsets instead of this concat/pad HBM round trip.
    z = jnp.concatenate([posterior_z, prior_z], axis=0).astype(jnp.float32)
    if padded != total:
        z = jnp.pad(z, ((0, padded - total), (0, 0)))
    sq = jnp.sum(z * z, axis=1, keepdims=True) * inv            # |z|^2 / D^2
    ones = jnp.ones_like(sq)
    p_aug = jnp.concatenate([z * (2.0 * inv), -sq, ones], axis=1)   # (padded, D+2)
    q_aug = jnp.concatenate([z, ones, -sq], axis=1)                 # (padded, D+2)
    daug = d + 2

    # Circulant column-offset grid: each unordered block pair visited once.
    if g % 2 == 0 and g > 1:
        n_t = g // 2 + 1
        mask_last_offset = True
    else:
        n_t = (g + 1) // 2
        mask_last_offset = False

    kernel = functools.partial(
        _mmd_tile_kernel, n=n, m=m, tile=tile, grid_blocks=g, n_t=n_t,
        mask_last_offset=mask_last_offset)

    partials = pl.pallas_call(
        kernel,
        out_shape=jax.ShapeDtypeStruct((g, 8, 128), jnp.float32),
        grid=(g, n_t),
        in_specs=[
            pl.BlockSpec((tile, daug), lambda i, t: (i, 0)),             # row tile of P
            pl.BlockSpec((tile, daug), lambda i, t: ((i + t) % g, 0)),   # col tile of Q
        ],
        out_specs=pl.BlockSpec((1, 8, 128), lambda i, t: (i, 0, 0)),
        scratch_shapes=[pltpu.VMEM((tile, 1), jnp.float32)],             # per-row acc
        compiler_params=pltpu.CompilerParams(
            dimension_semantics=("parallel", "arbitrary"),
            vmem_limit_bytes=48 * 1024 * 1024,
        ),
    )(p_aug, q_aug)

    # Every element of a row block's (8,128) output tile holds that block's
    # finalized partial sum; read one element per block and reduce.
    return jnp.sum(partials[:, 0, 0])


def _reference_mmd(x, y):
    # Pure-JAX reference mirroring the PyTorch broadcast implementation.
    d = x.shape[1]

    def kern(a, b):
        diff = a[:, None, :] - b[None, :, :]
        return jnp.exp(-jnp.mean(diff * diff, axis=2) / d)

    return jnp.mean(kern(x, x)) + jnp.mean(kern(y, y)) - 2.0 * jnp.mean(kern(x, y))


if __name__ == "__main__":
    key = jax.random.PRNGKey(0)
    k1, k2, k3, k4 = jax.random.split(key, 4)

    # Small case consistent with the module's usage (batch=8, latent_dim=32).
    batch, latent_dim = 8, 32
    posterior_z = jax.random.normal(k1, (batch, latent_dim), dtype=jnp.float32)
    prior_z = jax.random.normal(k2, (batch, latent_dim), dtype=jnp.float32)

    loss = continuous_kernel_mmd_loss(posterior_z, prior_z)
    jax.block_until_ready(loss)
    ref = _reference_mmd(posterior_z, prior_z)
    assert jnp.allclose(loss, ref, atol=3e-5, rtol=1e-4), (loss, ref)

    # Odd-G circulant grid + padding path (3 row blocks, tile=112).
    x2 = jax.random.normal(k3, (200, latent_dim), dtype=jnp.float32)
    y2 = jax.random.normal(k4, (120, latent_dim), dtype=jnp.float32)
    loss2 = continuous_kernel_mmd_loss(x2, y2, max_tile=128)
    jax.block_until_ready(loss2)
    ref2 = _reference_mmd(x2, y2)
    assert jnp.allclose(loss2, ref2, atol=3e-5, rtol=1e-4), (loss2, ref2)

    # Even-G path exercising the masked last offset (2 row blocks, tile=128).
    x3 = jax.random.normal(k3, (130, latent_dim), dtype=jnp.float32)
    y3 = jax.random.normal(k4, (126, latent_dim), dtype=jnp.float32)
    loss3 = continuous_kernel_mmd_loss(x3, y3, max_tile=128)
    jax.block_until_ready(loss3)
    ref3 = _reference_mmd(x3, y3)
    assert jnp.allclose(loss3, ref3, atol=3e-5, rtol=1e-4), (loss3, ref3)

    print("KERNEL_OK")
</pallas_src>

<mosaic_0001>
module attributes {stable_mosaic.version = 11 : i64} {
  func.func @_mmd_tile_kernel(%arg0: i32, %arg1: i32, %arg2: memref<16x34xf32, #tpu.memory_space<vmem>>, %arg3: memref<16x34xf32, #tpu.memory_space<vmem>>, %arg4: memref<1x8x128xf32, #tpu.memory_space<vmem>>, %arg5: memref<16x1xf32, #tpu.memory_space<vmem>>) attributes {dimension_semantics = [#tpu.dimension_semantics<parallel>, #tpu.dimension_semantics<arbitrary>], iteration_bounds = array<i64: 1, 1>, scalar_prefetch = 0 : i64, scratch_operands = 1 : i64, tpu.core_type = #tpu.core_type<tc>, window_params = [{transform_indices = @transform_0, window_bounds = array<i64: 16, 34>}, {transform_indices = @transform_1, window_bounds = array<i64: 16, 34>}, {transform_indices = @transform_2, window_bounds = array<i64: 1, 8, 128>}]} {
    %c0_i32 = arith.constant 0 : i32
    %0 = arith.cmpi eq, %arg1, %c0_i32 : i32
    %1 = arith.extui %0 : i1 to i32
    %c0_i32_0 = arith.constant 0 : i32
    %2 = arith.cmpi ne, %1, %c0_i32_0 : i32
    scf.if %2 {
      %cst_24 = arith.constant 0.000000e+00 : f32
      %47 = vector.broadcast %cst_24 : f32 to vector<16x1xf32>
      %c0_25 = arith.constant 0 : index
      %c0_26 = arith.constant 0 : index
      %48 = vector.load %arg5[%c0_25, %c0_26] : memref<16x1xf32, #tpu.memory_space<vmem>>, vector<16x1xf32>
      tpu.vector_store %arg5[%c0_25, %c0_26], %47 {strides = array<i32>} : memref<16x1xf32, #tpu.memory_space<vmem>>, vector<16x1xf32>,
    } else {
    }
    %c0 = arith.constant 0 : index
    %c0_1 = arith.constant 0 : index
    %3 = vector.load %arg2[%c0, %c0_1] : memref<16x34xf32, #tpu.memory_space<vmem>>, vector<16x34xf32>
    %c0_2 = arith.constant 0 : index
    %c0_3 = arith.constant 0 : index
    %4 = vector.load %arg3[%c0_2, %c0_3] : memref<16x34xf32, #tpu.memory_space<vmem>>, vector<16x34xf32>
    %cst = arith.constant dense<0.000000e+00> : vector<16x16xf32>
    %5 = tpu.matmul %3, %4, %cst {dimension_numbers = #tpu.dot_dimension_numbers<[1], [1], [0], [0], [0, 0, 1, 0], [], []>, precision = #tpu.contract_precision<fp32>} : vector<16x34xf32>, vector<16x34xf32>, vector<16x16xf32> -> vector<16x16xf32>
    %cst_4 = arith.constant 0.000000e+00 : f32
    %6 = vector.broadcast %cst_4 : f32 to vector<16x16xf32>
    %7 = arith.minimumf %5, %6 : vector<16x16xf32>
    %8 = math.exp %7 : vector<16x16xf32>
    %9 = arith.addi %arg0, %arg1 : i32
    %c1_i32 = arith.constant 1 : i32
    %c0_i32_5 = arith.constant 0 : i32
    %10 = arith.cmpi eq, %c1_i32, %c0_i32_5 : i32
    %c1_i32_6 = arith.constant 1 : i32
    %11 = arith.select %10, %c1_i32_6, %c1_i32 : i32
    %12 = arith.remsi %9, %11 : i32
    %c0_i32_7 = arith.constant 0 : i32
    %13 = arith.cmpi ne, %12, %c0_i32_7 : i32
    %c0_i32_8 = arith.constant 0 : i32
    %14 = arith.cmpi slt, %12, %c0_i32_8 : i32
    %c0_i32_9 = arith.constant 0 : i32
    %15 = arith.cmpi slt, %11, %c0_i32_9 : i32
    %16 = arith.xori %14, %15 : i1
    %17 = arith.andi %16, %13 : i1
    %18 = arith.addi %12, %11 : i32
    %19 = arith.select %17, %18, %12 : i32
    %c16_i32 = arith.constant 16 : i32
    %20 = arith.muli %19, %c16_i32 : i32
    %21 = tpu.iota {dimensions = array<i32: 1>} : vector<1x16xi32>
    %22 = vector.broadcast %20 : i32 to vector<1x16xi32>
    %23 = arith.addi %22, %21 : vector<1x16xi32>
    %c8_i32 = arith.constant 8 : i32
    %24 = vector.broadcast %c8_i32 : i32 to vector<1x16xi32>
    %25 = arith.cmpi slt, %23, %24 : vector<1x16xi32>
    %c16_i32_10 = arith.constant 16 : i32
    %26 = vector.broadcast %c16_i32_10 : i32 to vector<1x16xi32>
    %27 = arith.cmpi slt, %23, %26 : vector<1x16xi32>
    %cst_11 = arith.constant -1.250000e-01 : f32
    %cst_12 = arith.constant 0.000000e+00 : f32
    %28 = vector.broadcast %cst_11 : f32 to vector<1x16xf32>
    %29 = vector.broadcast %cst_12 : f32 to vector<1x16xf32>
    %30 = arith.select %27, %28, %29 : vector<1x16xi1>, vector<1x16xf32>
    %cst_13 = arith.constant 1.250000e-01 : f32
    %31 = vector.broadcast %cst_13 : f32 to vector<1x16xf32>
    %32 = arith.select %25, %31, %30 : vector<1x16xi1>, vector<1x16xf32>
    %c0_i32_14 = arith.constant 0 : i32
    %33 = arith.cmpi eq, %arg1, %c0_i32_14 : i32
    %cst_15 = arith.constant 1.000000e+00 : f32
    %cst_16 = arith.constant 2.000000e+00 : f32
    %34 = arith.select %33, %cst_15, %cst_16 : f32
    %c0_17 = arith.constant 0 : index
    %c0_18 = arith.constant 0 : index
    %35 = vector.load %arg5[%c0_17, %c0_18] : memref<16x1xf32, #tpu.memory_space<vmem>>, vector<16x1xf32>
    %36 = vector.broadcast %34 : f32 to vector<1x16xf32>
    %37 = arith.mulf %32, %36 : vector<1x16xf32>
    %38 = vector.broadcast %37 : vector<1x16xf32> to vector<16x16xf32>
    %39 = arith.mulf %8, %38 : vector<16x16xf32>
    %cst_19 = arith.constant dense<0.000000e+00> : vector<16xf32>
    %40 = vector.multi_reduction <add>, %39, %cst_19 [1] : vector<16x16xf32> to vector<16xf32>
    %41 = vector.shape_cast %40 : vector<16xf32> to vector<16x1xf32>
    %42 = arith.addf %35, %41 : vector<16x1xf32>
    %c0_20 = arith.constant 0 : index
    %c0_21 = arith.constant 0 : index
    %43 = vector.load %arg5[%c0_20, %c0_21] : memref<16x1xf32, #tpu.memory_space<vmem>>, vector<16x1xf32>
    tpu.vector_store %arg5[%c0_20, %c0_21], %42 {strides = array<i32>} : memref<16x1xf32, #tpu.memory_space<vmem>>, vector<16x1xf32>,
    %c0_i32_22 = arith.constant 0 : i32
    %44 = arith.cmpi eq, %arg1, %c0_i32_22 : i32
    %45 = arith.extui %44 : i1 to i32
    %c0_i32_23 = arith.constant 0 : i32
    %46 = arith.cmpi ne, %45, %c0_i32_23 : i32
    scf.if %46 {
      %c16_i32_24 = arith.constant 16 : i32
      %47 = arith.muli %arg0, %c16_i32_24 : i32
      %48 = tpu.iota {dimensions = array<i32: 0>} : vector<16x1xi32>
      %49 = vector.broadcast %47 : i32 to vector<16x1xi32>
      %50 = arith.addi %49, %48 : vector<16x1xi32>
      %c8_i32_25 = arith.constant 8 : i32
      %51 = vector.broadcast %c8_i32_25 : i32 to vector<16x1xi32>
      %52 = arith.cmpi slt, %50, %51 : vector<16x1xi32>
      %c16_i32_26 = arith.constant 16 : i32
      %53 = vector.broadcast %c16_i32_26 : i32 to vector<16x1xi32>
      %54 = arith.cmpi slt, %50, %53 : vector<16x1xi32>
      %cst_27 = arith.constant -1.250000e-01 : f32
      %cst_28 = arith.constant 0.000000e+00 : f32
      %55 = vector.broadcast %cst_27 : f32 to vector<16x1xf32>
      %56 = vector.broadcast %cst_28 : f32 to vector<16x1xf32>
      %57 = arith.select %54, %55, %56 : vector<16x1xi1>, vector<16x1xf32>
      %cst_29 = arith.constant 1.250000e-01 : f32
      %58 = vector.broadcast %cst_29 : f32 to vector<16x1xf32>
      %59 = arith.select %52, %58, %57 : vector<16x1xi1>, vector<16x1xf32>
      %c0_30 = arith.constant 0 : index
      %c0_31 = arith.constant 0 : index
      %60 = vector.load %arg5[%c0_30, %c0_31] : memref<16x1xf32, #tpu.memory_space<vmem>>, vector<16x1xf32>
      %61 = arith.mulf %59, %60 : vector<16x1xf32>
      %62 = vector.shape_cast %61 : vector<16x1xf32> to vector<1x16x1xf32>
      %cst_32 = arith.constant dense<0.000000e+00> : vector<1xf32>
      %63 = vector.multi_reduction <add>, %62, %cst_32 [1, 2] : vector<1x16x1xf32> to vector<1xf32>
      %64 = vector.shape_cast %63 : vector<1xf32> to vector<1x1x1xf32>
      %65 = vector.extract %64[0, 0, 0] : f32 from vector<1x1x1xf32>
      %66 = vector.broadcast %65 : f32 to vector<1x8x128xf32>
      %c0_33 = arith.constant 0 : index
      %c0_34 = arith.constant 0 : index
      %c0_35 = arith.constant 0 : index
      %67 = vector.load %arg4[%c0_33, %c0_34, %c0_35] : memref<1x8x128xf32, #tpu.memory_space<vmem>>, vector<1x8x128xf32>
      tpu.vector_store %arg4[%c0_33, %c0_34, %c0_35], %66 {strides = array<i32>} : memref<1x8x128xf32, #tpu.memory_space<vmem>>, vector<1x8x128xf32>,
    } else {
    }
    return
  }
  func.func @transform_0(%arg0: i32, %arg1: i32) -> (i32, i32) {
    %c0_i32 = arith.constant 0 : i32
    %c0_i32_0 = arith.constant 0 : i32
    return %arg0, %c0_i32 : i32, i32
  }
  func.func @transform_1(%arg0: i32, %arg1: i32) -> (i32, i32) {
    %0 = arith.addi %arg0, %arg1 : i32
    %c1_i32 = arith.constant 1 : i32
    %c0_i32 = arith.constant 0 : i32
    %1 = arith.cmpi eq, %c1_i32, %c0_i32 : i32
    %c1_i32_0 = arith.constant 1 : i32
    %2 = arith.select %1, %c1_i32_0, %c1_i32 : i32
    %3 = arith.remsi %0, %2 : i32
    %c0_i32_1 = arith.constant 0 : i32
    %4 = arith.cmpi ne, %3, %c0_i32_1 : i32
    %c0_i32_2 = arith.constant 0 : i32
    %5 = arith.cmpi slt, %3, %c0_i32_2 : i32
    %c0_i32_3 = arith.constant 0 : i32
    %6 = arith.cmpi slt, %2, %c0_i32_3 : i32
    %7 = arith.xori %5, %6 : i1
    %8 = arith.andi %7, %4 : i1
    %9 = arith.addi %3, %2 : i32
    %10 = arith.select %8, %9, %3 : i32
    %c0_i32_4 = arith.constant 0 : i32
    %c0_i32_5 = arith.constant 0 : i32
    return %10, %c0_i32_4 : i32, i32
  }
  func.func @transform_2(%arg0: i32, %arg1: i32) -> (i32, i32, i32) {
    %c0_i32 = arith.constant 0 : i32
    %c0_i32_0 = arith.constant 0 : i32
    %c0_i32_1 = arith.constant 0 : i32
    return %arg0, %c0_i32, %c0_i32_0 : i32, i32, i32
  }
}

</mosaic_0001>

<bundles_post_ra>
// kernel: tpu_custom_call.1
= control target key start
LH: loop header
LB: loop body
LE: loop exit
PB: predicated region body
PF: predicated region fallthrough
CT: control target
= control target key end

     0   :  { %7 = vsyncpa [#allocation4], 0  ;;  %s896_s0 = inlined_call_operand.hbm [shape: f32[16,34], index: 0, kind: input, shape index: {}]   ;;  %s897_s1 = inlined_call_operand.hbm [shape: f32[16,34], index: 1, kind: input, shape index: {}]   ;;  %s898_s2 = inlined_call_operand.hbm [shape: f32[1,8,128], index: 2, kind: output, shape index: {}]  }
   0x1   :  { %8 = vsyncpa [#allocation7], 0 }
   0x2   :  { %9 = vsyncpa [#allocation5], 0  ;;  %s833_s9 = smov [#allocation3]   ;;  %s761_s13 = scalar_lea.hbm %s896_s0, 256 }
   0x3   :  { %s15_s10 = sshll.u32 %s833_s9, 4  ;;  %p762_p0 = scmp.ne.s32.totalorder %s896_s0, %s761_s13  ;;  %s16_s10 = int_to_ptr.vmem [resolvable:$true] %s15_s10 }
   0x4   :  { %p765_p1 = scmp.lt.u32.totalorder %s761_s13, %s896_s0 }
   0x6   :  { %p767_p2 = pnand %p765_p1, %p762_p0 }
   0x8   :  { %770 = shalt.err (!%p767_p2)
}
   0x9   :  { %s771_s18 = scalar_lea.vmem %s16_s10, 256  ;;  %p776_p4 = scmp.lt.s32.totalorder %s16_s10, %s16_s10 }
   0xa   :  { %p772_p3 = scmp.ne.s32.totalorder %s16_s10, %s771_s18  ;;  %p777_p5 = scmp.lt.s32.totalorder %s771_s18, %s771_s18 }
   0xc   :  { %p778_p6 = por %p777_p5, %p776_p4 }
   0xe   :  { %p779_p7 = pnand %p778_p6, %p772_p3 }
  0x10   :  { %782 = shalt.err (!%p779_p7)
}
  0x11   :  { %s834_s19 = smov 128   ;;  %s835_s20 = smov 8  }
  0x12   :  { %21 = dma.hbm_to_vmem [thread:$0]  %s896_s0, 256, %s16_s10, [#allocation4], %s834_s19, %s834_s19, %s835_s20  }
  0x13   :  { %s836_s23 = smov [#allocation6]   ;;  %s783_s27 = scalar_lea.hbm %s897_s1, 256 }
  0x14   :  { %s27_s24 = sshll.u32 %s836_s23, 4  ;;  %p784_p8 = scmp.ne.s32.totalorder %s897_s1, %s783_s27  ;;  %s28_s24 = int_to_ptr.vmem [resolvable:$true] %s27_s24 }
  0x15   :  { %p787_p9 = scmp.lt.u32.totalorder %s783_s27, %s897_s1 }
  0x17   :  { %p789_p10 = pnand %p787_p9, %p784_p8 }
  0x19   :  { %792 = shalt.err (!%p789_p10)
}
  0x1a   :  { %s793_s4 = scalar_lea.vmem %s28_s24, 256  ;;  %p798_p12 = scmp.lt.s32.totalorder %s28_s24, %s28_s24 }
  0x1b   :  { %p794_p11 = scmp.ne.s32.totalorder %s28_s24, %s793_s4  ;;  %p799_p13 = scmp.lt.s32.totalorder %s793_s4, %s793_s4 }
  0x1d   :  { %p800_p0 = por %p799_p13, %p798_p12 }
  0x1f   :  { %p801_p1 = pnand %p800_p0, %p794_p11 }
  0x21   :  { %804 = shalt.err (!%p801_p1)
}
  0x22   :  { %33 = dma.hbm_to_vmem [thread:$0]  %s897_s1, 256, %s28_s24, [#allocation7], %s834_s19, %s834_s19, %s835_s20  }
  0x23   :  { %827 = dma.done.wait [#allocation4], 256  }
  0x24   :  { %828 = vsyncadd [#allocation4], 4294967040 }
  0x25   :  { %829 = dma.done.wait [#allocation7], 256  }
  0x26   :  { %830 = vsyncadd [#allocation7], 4294967040  ;;  %vm51_vm0 = vcmask 277504   ;;  %v49_v0 = vld [vmem:[#allocation6] sm:$0xff]  ;;  %v50_v1 = vld [vmem:[#allocation6 + $0x8] sm:$0xff]  ;;  %vm44_vm1 = vcmask 7168   ;;  %v572_v38 = vlaneseq }
  0x27   :  { %v47_v2 = vld [vmem:[#allocation3] sm:$0xff]  ;;  %v59_v3 = vsel %vm51_vm0, %v49_v0, 0  ;;  %v62_v4 = vsel %vm51_vm0, %v50_v1, 0  ;;  %v48_v6 = vld [vmem:[#allocation3 + $0x8] sm:$0xff]  ;;  %v837_v32 = vmov 0.0   ;;  %vm585_vm4 = vcmask 130048  }
  0x28   :  { %v53_v5 = vsel %vm51_vm0, %v47_v2, 0  ;;  %v65_v7 = vand.u32 4294901760, %v59_v3  ;;  %v68_v8 = vand.u32 4294901760, %v62_v4  ;;  %v56_v10 = vsel %vm51_vm0, %v48_v6, 0  ;;  %45 = vst.msk [vmem:[#allocation2] sm:$0xff] %vm44_vm1, %v837_v32  ;;  %46 = vst.msk [vmem:[#allocation2 + $0x8] sm:$0xff] %vm44_vm1, %v837_v32 }
  0x29   :  { %v131_v9 = vand.u32 4294901760, %v53_v5  ;;  %v141_v11 = vand.u32 4294901760, %v56_v10  ;;  %v573_v43 = vand.u32 127, %v572_v38  ;;  %s838_s1 = smov [#allocation8]  }
  0x2a   :  { %v715_v12 = vpack.c.bf16 %v68_v8, %v65_v7  ;;  %v153_v14 = vsub.f32 %v59_v3, %v65_v7  ;;  %v160_v15 = vsub.f32 %v62_v4, %v68_v8  ;;  %s639_s6 = sshll.u32 %s838_s1, 4  ;;  %s640_s6 = int_to_ptr.vmem [resolvable:$true] %s639_s6 }
  0x2b   :  { %v132_v13 = vsub.f32 %v53_v5, %v131_v9  ;;  %v142_v16 = vsub.f32 %v56_v10, %v141_v11  ;;  %vm575_vm2 = vcmp.lt.s32.totalorder %v573_v43, 16  ;;  %vm574_vm3 = vcmp.lt.s32.totalorder %v573_v43, 8  ;;  %s805_s8 = scalar_lea.vmem %s640_s6, 128  ;;  %p810_p3 = scmp.lt.s32.totalorder %s640_s6, %s640_s6 }
  0x2c   :  { %716 = vmatprep.subr.bf16.mxu1 %v715_v12  ;;  %728 = vmatprep.subr.bf16.mxu0 %v715_v12  ;;  %v154_v18 = vand.u32 4294901760, %v153_v14  ;;  %v161_v19 = vand.u32 4294901760, %v160_v15  ;;  %v723_v31 = vpack.c.bf16 %v160_v15, %v153_v14  ;;  %v576_v45 = vsel %vm575_vm2, -0.125, %v837_v32  ;;  %p806_p2 = scmp.ne.s32.totalorder %s640_s6, %s805_s8  ;;  %p811_p4 = scmp.lt.s32.totalorder %s805_s8, %s805_s8 }
  0x2d   :  { %v133_v17 = vand.u32 4294901760, %v132_v13  ;;  %718 = vmatpush3.bf16.xpose.msra.mxu1 %v715_v12  ;;  %730 = vmatpush3.bf16.xpose.msra.mxu0 %v715_v12  ;;  %v143_v20 = vand.u32 4294901760, %v142_v16  ;;  %v577_v46 = vsel %vm574_vm3, 0.125, %v576_v45 }
  0x2e   :  { %v155_v22 = vsub.f32 %v153_v14, %v154_v18  ;;  %v162_v23 = vsub.f32 %v160_v15, %v161_v19  ;;  %v731_v24 = vpack.c.bf16 %v161_v19, %v154_v18  ;;  %p812_p5 = por %p811_p4, %p810_p3 }
  0x2f   :  { %v134_v21 = vsub.f32 %v132_v13, %v133_v17  ;;  %698 = vmatprep.mubr.f32.mxu0 %v133_v17  ;;  %v144_v25 = vsub.f32 %v142_v16, %v143_v20  ;;  %v579_v53 = vld [vmem:[#allocation2] sm:$0xff]  ;;  %v580_v56 = vld [vmem:[#allocation2 + $0x8] sm:$0xff] }
  0x30   :  { %v156_v27 = vand.u32 4294901760, %v155_v22  ;;  %v163_v28 = vand.u32 4294901760, %v162_v23  ;;  %732 = vmatprep.subr.bf16.mxu0 %v731_v24  ;;  %p813_p6 = pnand %p812_p5, %p806_p2 }
  0x31   :  { %v135_v26 = vand.u32 4294901760, %v134_v21  ;;  %v145_v29 = vand.u32 4294901760, %v144_v25 }
  0x32   :  { %v719_v30 = vpack.c.bf16 %v163_v28, %v156_v27 }
  0x33   :  { %677 = vmatprep.mubr.f32.mxu1 %v135_v26 }
  0x34   :  { %678 = vmatmul.mubr.f32.vlgmr.msra.gmra.mrb[0].mxu1 %v145_v29  ;;  %720 = vmatprep.subr.bf16.mxu1 %v719_v30 }
  0x35   :  { %699 = vmatmul.mubr.f32.vlgmr.msra.gmra.mrb[0].mxu0 %v143_v20  ;;  %722 = vmatpush3.bf16.xpose.msra.mxu1 %v719_v30 }
  0x36   :  { %734 = vmatpush3.bf16.xpose.msra.mxu0 %v731_v24  ;;  %684 = vmatprep.mubr.f32.mxu1 %v131_v9 }
  0x37   :  { %705 = vmatprep.mubr.f32.mxu0 %v131_v9  ;;  %724 = vmatprep.subr.bf16.mxu1 %v723_v31 }
  0x38   :  { %736 = vmatprep.subr.bf16.mxu0 %v715_v12 }
  0x3c   :  { %685 = vmatmul.mubr.f32.vlgmr.msra.gmra.mrb[0].mxu1 %v141_v11 }
  0x3d   :  { %706 = vmatmul.mubr.f32.vlgmr.msra.gmra.mrb[0].mxu0 %v141_v11  ;;  %726 = vmatpush3.bf16.xpose.msra.mxu1 %v723_v31 }
  0x3e   :  { %738 = vmatpush3.bf16.xpose.msra.mxu0 %v715_v12  ;;  %691 = vmatprep.mubr.f32.mxu1 %v132_v13 }
  0x3f   :  { %712 = vmatprep.mubr.f32.mxu0 %v131_v9 }
  0x44   :  { %692 = vmatmul.mubr.f32.vlgmr.msra.gmra.mrb[0].mxu1 %v142_v16 }
  0x45   :  { %713 = vmatmul.mubr.f32.vlgmr.msra.gmra.mrb[0].mxu0 %v141_v11 }
 0x117   :  { %v693_v33 = vpop.f32.mrb[0].mxu1 }
 0x118   :  { %v714_v34 = vpop.f32.mrb[0].mxu0  ;;  %v310_v35 = vpop.f32.mrb[1].mxu1 }
 0x119   :  { %v739_v36 = vadd.f32 %v714_v34, %v693_v33  ;;  %v556_v37 = vpop.f32.mrb[1].mxu0 }
 0x11a   :  { %v740_v39 = vadd.f32 %v556_v37, %v310_v35 }
 0x11b   :  { %v567_v40 = vmin.f32 %v739_v36, 0.0 }
 0x11c   :  { %v566_v41 = vmin.f32 %v740_v39, 0.0 }
 0x11d   :  { %v570_v42 = vmul.f32 1.442695, %v567_v40 }
 0x11e   :  { %v568_v44 = vmul.f32 1.442695, %v566_v41 }
 0x11f   :  { %757 = vpow2.f32 %v570_v42 }
 0x120   :  { %759 = vpow2.f32 %v568_v44 }
 0x129   :  { %v758_v47 = vpop.eup %757 }
 0x12a   :  { %v760_v48 = vpop.eup %759  ;;  %v584_v49 = vmul.f32 %v758_v47, %v577_v46 }
 0x12b   :  { %v583_v50 = vmul.f32 %v760_v48, %v577_v46 }
 0x12c   :  { %v589_v52 = vsel %vm585_vm4, %v584_v49, 0.0 }
 0x12d   :  { %v586_v51 = vsel %vm585_vm4, %v583_v50, 0.0 }
 0x12e   :  { %587 = vadd.xlane.f32.xlu0 %v586_v51 }
 0x132   :  { %590 = vadd.xlane.f32.xlu0 %v589_v52 }
 0x1bb   :  { %v588_v54 = vpop.xlane.xlu0 %587 }
 0x1bc   :  { %v592_v55 = vadd.f32 %v588_v54, %v579_v53 }
 0x1be   :  { %595 = vst.msk [vmem:[#allocation2] sm:$0xff] %vm44_vm1, %v592_v55 }
 0x1bf   :  { %v591_v57 = vpop.xlane.xlu0 %590 }
 0x1c0   :  { %v593_v58 = vadd.f32 %v591_v57, %v580_v56 }
 0x1c2   :  { %596 = vst.msk [vmem:[#allocation2 + $0x8] sm:$0xff] %vm44_vm1, %v593_v58 }
 0x1c5   :  { %v615_v59 = vld [vmem:[#allocation2] sm:$0xff] }
 0x1c6   :  { %v617_v60 = vmul.f32 0.125, %v615_v59 }
 0x1c8   :  { %v619_v63 = vsel %vm44_vm1, %v617_v60, 0.0 }
 0x1c9   :  { %v616_v61 = vld [vmem:[#allocation2 + $0x8] sm:$0xff] }
 0x1ca   :  { %v618_v62 = vmul.f32 -0.125, %v616_v61 }
 0x1cc   :  { %v620_v0 = vsel %vm44_vm1, %v618_v62, 0.0 }
 0x1cd   :  { %v621_v1 = vadd.f32 %v620_v0, %v619_v63 }
 0x1cf   :  { %622 = vadd.xlane.f32.xlu1 %v621_v1 }
 0x25c   :  { %v623_v2 = vpop.xlane.xlu1 %622 }
 0x25d   :  { %v624_v3 = vrot.slane %v623_v2, 4 }
 0x25f   :  { %v625_v4 = vadd.f32 %v624_v3, %v623_v2 }
 0x261   :  { %v626_v5 = vrot.slane %v625_v4, 2 }
 0x263   :  { %v627_v6 = vadd.f32 %v626_v5, %v625_v4 }
 0x265   :  { %v628_v7 = vrot.slane %v627_v6, 1 }
 0x267   :  { %v629_v8 = vadd.f32 %v628_v7, %v627_v6 }
 0x269   :  { %749 = vpush %v629_v8 }
 0x29a   :  { %s750_s7 = spop %749 }
 0x29b   :  { %v631_v9 = vstv %s750_s7 }
 0x29c   :  { %632 = vst [vmem:[#allocation8] sm:$0xff] %v631_v9 }
 0x29d   :  { %816 = shalt.err (!%p813_p6)
}
 0x29e   :  { %s817_s11 = scalar_lea.hbm %s898_s2, 128 }
 0x29f   :  { %p818_p7 = scmp.ne.s32.totalorder %s898_s2, %s817_s11  ;;  %p821_p8 = scmp.lt.u32.totalorder %s817_s11, %s898_s2 }
 0x2a1   :  { %p823_p9 = pnand %p821_p8, %p818_p7 }
 0x2a3   :  { %826 = shalt.err (!%p823_p9)
}
 0x2a4   :  { %642 = dma.vmem_to_hbm [thread:$0]  %s640_s6, 128, %s898_s2, [#allocation5]  }
 0x2a5   :  { %831 = dma.done.wait [#allocation5], 128  }
 0x2a6   :  { %832 = vsyncadd [#allocation5], 4294967168 }
 0x2a7   :  { %646 = vsyncpa [#allocation4], 1 }
 0x2a8   :  { %647 = vsyncpa [#allocation7], 1 }
 0x2a9   :  { %648 = vsyncpa [#allocation5], 1 }

</bundles_post_ra>
